<compile_context>
chip_gen: v7x
topology: tpu7x:2x2x1
jax: 0.10.0
libtpu: 0.0.40
codegen_flags: <defaults>
</compile_context>

<pallas_src>
import jax
import jax.numpy as jnp
from jax.experimental import pallas as pl
from jax.experimental.pallas import tpu as pltpu


def _round_up(x, m):
    return ((x + m - 1) // m) * m


def augru_kernel(x_ref, h_ref, att_ref, wx_ref, wh_ref, b_ref, out_ref):
    """One batch tile of the AUGRU cell.

    x_ref  : (TM, I)    inputs (caller dtype, cast to matmul dtype in VMEM)
    h_ref  : (TM, H)    previous hidden state (single stream, reused for blend)
    att_ref: (TM, 1)    attention scores, f32
    wx_ref : (I, Gp)    fused input->gate weights  [r | z | i_n | 0   ] (packed, padded)
    wh_ref : (H, Gp)    fused hidden->gate weights [r | z | 0   | h_n ]
    b_ref  : (1, Gp)    fused bias [b_ir+b_hr | b_iz+b_hz | b_in | b_hn], f32
    out_ref: (TM, H)
    """
    hidden = out_ref.shape[-1]

    x = x_ref[...].astype(wx_ref.dtype)
    h_f32 = h_ref[...].astype(jnp.float32)          # f32 view for the final blend
    h_mm = h_f32.astype(wh_ref.dtype)

    # Two MXU matmuls accumulated in f32 (single fused gate block).
    g = jnp.dot(x, wx_ref[...], preferred_element_type=jnp.float32)
    g = g + jnp.dot(h_mm, wh_ref[...], preferred_element_type=jnp.float32)
    g = g + b_ref[...]

    # Packed gate slices (width H each). All gate math in f32.
    reset_gate = jax.nn.sigmoid(g[:, 0:hidden])                 # sigma(i_r + h_r + b)
    update_gate = jax.nn.sigmoid(g[:, hidden:2 * hidden])       # sigma(i_z + h_z + b)
    i_n = g[:, 2 * hidden:3 * hidden]
    h_n = g[:, 3 * hidden:4 * hidden]
    new_state = jnp.tanh(i_n + reset_gate * h_n)

    u = att_ref[...] * update_gate                               # attentional update gate
    hy = (1.0 - u) * h_f32 + u * new_state
    out_ref[...] = hy.astype(out_ref.dtype)


def prepare_augru_params(weight_ih, weight_hh, bias_ih=None, bias_hh=None,
                         matmul_dtype=jnp.bfloat16, hh_matmul_dtype=None):
    """Build fused (I, Gp) / (H, Gp) weights and (1, Gp) bias once (hoist out of scan).

    PyTorch layout: weight_ih (3H, I), weight_hh (3H, H), gate order [r, z, n].
    Gate columns are packed contiguously: [r | z | i_n | h_n], Gp = round_up(4H, 128).
    `hh_matmul_dtype` lets the recurrent matmul stay in f32 (long-scan accuracy)
    while the input matmul runs in bf16.
    """
    three_h, input_size = weight_ih.shape
    hidden = three_h // 3
    gp = _round_up(4 * hidden, 128)
    if hh_matmul_dtype is None:
        hh_matmul_dtype = matmul_dtype

    w_ir, w_iz, w_in = jnp.split(weight_ih, 3, axis=0)   # each (H, I)
    w_hr, w_hz, w_hn = jnp.split(weight_hh, 3, axis=0)   # each (H, H)

    wx = jnp.concatenate(
        [w_ir.T, w_iz.T, w_in.T,
         jnp.zeros((input_size, hidden), weight_ih.dtype)], axis=1)        # (I, 4H)
    wh = jnp.concatenate(
        [w_hr.T, w_hz.T,
         jnp.zeros((hidden, hidden), weight_hh.dtype), w_hn.T], axis=1)    # (H, 4H)
    wx = jnp.pad(wx, ((0, 0), (0, gp - 4 * hidden))).astype(matmul_dtype)
    wh = jnp.pad(wh, ((0, 0), (0, gp - 4 * hidden))).astype(hh_matmul_dtype)

    if bias_ih is None:
        bias_ih = jnp.zeros((three_h,), jnp.float32)
    if bias_hh is None:
        bias_hh = jnp.zeros((three_h,), jnp.float32)
    b_ir, b_iz, b_in = jnp.split(bias_ih.astype(jnp.float32), 3)
    b_hr, b_hz, b_hn = jnp.split(bias_hh.astype(jnp.float32), 3)
    fused_b = jnp.concatenate([b_ir + b_hr, b_iz + b_hz, b_in, b_hn])
    fused_b = jnp.pad(fused_b, (0, gp - 4 * hidden)).reshape(1, gp)

    return wx, wh, fused_b


def augru_cell_fused(inputs, hx, att_score, wx, wh, fused_b, *,
                     block_rows=1024, out_dtype=None):
    """AUGRU forward using pre-fused params.

    inputs (B, I), hx (B, H), att_score (B,) or (B, 1) -> hy (B, H).
    """
    batch, input_size = inputs.shape
    hidden = hx.shape[-1]
    gp = wx.shape[-1]
    assert wx.shape[0] == input_size and wh.shape[0] == hidden, \
        "fused weights do not match input/hidden sizes"
    assert gp >= 4 * hidden and gp % 128 == 0
    out_dtype = hx.dtype if out_dtype is None else out_dtype

    att = att_score.reshape(-1, 1).astype(jnp.float32)

    # Batch tiling: multiple of 8 sublanes; pick the tile count first so the
    # round-up padding stays small, and force >=2 grid steps for large batches
    # so the "parallel" grid axis can shard across v7x's two TensorCores.
    bp8 = _round_up(batch, 8)
    block_rows = max(8, _round_up(block_rows, 8))
    num_tiles = pl.cdiv(bp8, block_rows)
    if num_tiles == 1 and bp8 >= 256:
        num_tiles = 2
    tm = _round_up(pl.cdiv(bp8, num_tiles), 8)
    num_tiles = pl.cdiv(bp8, tm)
    bp = num_tiles * tm

    if bp != batch:
        pad = bp - batch
        inputs = jnp.pad(inputs, ((0, pad), (0, 0)))
        hx_p = jnp.pad(hx, ((0, pad), (0, 0)))
        att = jnp.pad(att, ((0, pad), (0, 0)))
    else:
        hx_p = hx

    # VMEM budget: (double-buffered) weights/bias + double-buffered activation
    # tiles + f32 gate intermediate.  Cap at ~85% of the queried per-chip VMEM
    # (128 MiB on v5e/v6e, 64 MiB on v7x); fall back conservatively if the query
    # is unavailable.
    w_bytes = (wx.size * wx.dtype.itemsize + wh.size * wh.dtype.itemsize
               + fused_b.size * fused_b.dtype.itemsize)
    act_bytes = tm * (input_size * inputs.dtype.itemsize
                      + hidden * hx_p.dtype.itemsize
                      + 4
                      + hidden * jnp.dtype(out_dtype).itemsize)
    est = 2 * w_bytes + 2 * act_bytes + 2 * tm * gp * 4
    try:
        cap = int(pltpu.get_tpu_info().vmem_capacity_bytes)
    except Exception:
        cap = 64 * 1024 * 1024
    vmem_limit = int(min(max(2 * est, 32 * 1024 * 1024), int(0.85 * cap)))

    out = pl.pallas_call(
        augru_kernel,
        out_shape=jax.ShapeDtypeStruct((bp, hidden), out_dtype),
        grid_spec=pltpu.PrefetchScalarGridSpec(
            num_scalar_prefetch=0,
            grid=(num_tiles,),
            in_specs=[
                pl.BlockSpec((tm, input_size), lambda i: (i, 0)),   # x tile
                pl.BlockSpec((tm, hidden), lambda i: (i, 0)),       # h tile
                pl.BlockSpec((tm, 1), lambda i: (i, 0)),            # att tile
                pl.BlockSpec((input_size, gp), lambda i: (0, 0)),   # Wx (resident)
                pl.BlockSpec((hidden, gp), lambda i: (0, 0)),       # Wh (resident)
                pl.BlockSpec((1, gp), lambda i: (0, 0)),            # bias (resident)
            ],
            out_specs=pl.BlockSpec((tm, hidden), lambda i: (i, 0)),
        ),
        compiler_params=pltpu.CompilerParams(
            dimension_semantics=("parallel",),
            vmem_limit_bytes=vmem_limit,
        ),
    )(inputs, hx_p, att, wx, wh, fused_b)

    return out[:batch]


def augru_cell(inputs, hx, att_score, weight_ih, weight_hh, bias_ih, bias_hh,
               matmul_dtype=jnp.bfloat16, block_rows=1024, out_dtype=None):
    """Convenience wrapper. For per-timestep use inside a scan, call
    prepare_augru_params() once outside and reuse it with augru_cell_fused()."""
    wx, wh, fused_b = prepare_augru_params(weight_ih, weight_hh, bias_ih, bias_hh,
                                           matmul_dtype=matmul_dtype)
    return augru_cell_fused(inputs, hx, att_score, wx, wh, fused_b,
                            block_rows=block_rows, out_dtype=out_dtype)


def augru_cell_ref(inputs, hx, att_score, weight_ih, weight_hh, bias_ih, bias_hh):
    """Pure-JAX f32 reference matching the PyTorch module."""
    gi = inputs @ weight_ih.T + bias_ih
    gh = hx @ weight_hh.T + bias_hh
    H = hx.shape[-1]
    i_r, i_z, i_n = gi[:, :H], gi[:, H:2 * H], gi[:, 2 * H:]
    h_r, h_z, h_n = gh[:, :H], gh[:, H:2 * H], gh[:, 2 * H:]
    reset = jax.nn.sigmoid(i_r + h_r)
    update = jax.nn.sigmoid(i_z + h_z)
    new_state = jnp.tanh(i_n + reset * h_n)
    update = att_score.reshape(-1, 1) * update
    return (1.0 - update) * hx + update * new_state


if __name__ == "__main__":
    B, I, H = 8, 16, 32

    key = jax.random.PRNGKey(0)
    k1, k2, k3, k4, k5, k6, k7, k8 = jax.random.split(key, 8)

    inputs = jax.random.normal(k1, (B, I), dtype=jnp.float32)
    hx = jax.random.normal(k2, (B, H), dtype=jnp.float32)
    att_score = jax.random.uniform(k3, (B,), dtype=jnp.float32)

    # Deterministic parameter init (PyTorch module zero-inits biases when bias=True).
    weight_ih = 0.1 * jax.random.normal(k4, (3 * H, I), dtype=jnp.float32)
    weight_hh = 0.1 * jax.random.normal(k5, (3 * H, H), dtype=jnp.float32)
    bias_ih = jnp.zeros((3 * H,), dtype=jnp.float32)
    bias_hh = jnp.zeros((3 * H,), dtype=jnp.float32)

    hy_ref = augru_cell_ref(inputs, hx, att_score, weight_ih, weight_hh,
                            bias_ih, bias_hh)

    # Exact path: f32 matmuls, tight tolerance.
    wx32, wh32, b32 = prepare_augru_params(weight_ih, weight_hh, bias_ih, bias_hh,
                                           matmul_dtype=jnp.float32)
    hy_f32 = jax.block_until_ready(
        augru_cell_fused(inputs, hx, att_score, wx32, wh32, b32))
    assert hy_f32.shape == (B, H)
    assert jnp.allclose(hy_f32, hy_ref, atol=1e-5, rtol=1e-5), \
        "f32 kernel mismatch vs JAX reference"

    # Fast path (recommended on v6e/v7x): bf16 matmuls, f32 gate math.
    wxbf, whbf, bbf = prepare_augru_params(weight_ih, weight_hh, bias_ih, bias_hh,
                                           matmul_dtype=jnp.bfloat16)
    hy_bf16 = jax.block_until_ready(
        augru_cell_fused(inputs, hx, att_score, wxbf, whbf, bbf))
    assert hy_bf16.shape == (B, H)
    assert jnp.allclose(hy_bf16, hy_ref, atol=2e-2, rtol=2e-2), \
        "bf16 kernel mismatch vs JAX reference"

    # Multi-tile + ragged batch path (exercises grid > 1, row padding, packed gates).
    B2 = 40
    inputs2 = jax.random.normal(k6, (B2, I), dtype=jnp.float32)
    hx2 = jax.random.normal(k7, (B2, H), dtype=jnp.float32)
    att2 = jax.random.uniform(k8, (B2,), dtype=jnp.float32)
    hy2_ref = augru_cell_ref(inputs2, hx2, att2, weight_ih, weight_hh,
                             bias_ih, bias_hh)
    hy2 = jax.block_until_ready(
        augru_cell_fused(inputs2, hx2, att2, wx32, wh32, b32, block_rows=16))
    assert hy2.shape == (B2, H)
    assert jnp.allclose(hy2, hy2_ref, atol=1e-5, rtol=1e-5), \
        "multi-tile kernel mismatch vs JAX reference"

    print("KERNEL_OK")
</pallas_src>

<mosaic_0001>
module attributes {stable_mosaic.version = 11 : i64} {
  func.func @augru_kernel(%arg0: i32, %arg1: memref<8x16xf32, #tpu.memory_space<vmem>>, %arg2: memref<8x32xf32, #tpu.memory_space<vmem>>, %arg3: memref<8x1xf32, #tpu.memory_space<vmem>>, %arg4: memref<16x128xf32, #tpu.memory_space<vmem>>, %arg5: memref<32x128xf32, #tpu.memory_space<vmem>>, %arg6: memref<1x128xf32, #tpu.memory_space<vmem>>, %arg7: memref<8x32xf32, #tpu.memory_space<vmem>>) attributes {dimension_semantics = [#tpu.dimension_semantics<parallel>], iteration_bounds = array<i64: 1>, scalar_prefetch = 0 : i64, scratch_operands = 0 : i64, tpu.core_type = #tpu.core_type<tc>, window_params = [{transform_indices = @transform_0, window_bounds = array<i64: 8, 16>}, {transform_indices = @transform_1, window_bounds = array<i64: 8, 32>}, {transform_indices = @transform_2, window_bounds = array<i64: 8, 1>}, {pipeline_mode = #tpu.pipeline_mode<synchronous>, transform_indices = @transform_3, window_bounds = array<i64: 16, 128>}, {pipeline_mode = #tpu.pipeline_mode<synchronous>, transform_indices = @transform_4, window_bounds = array<i64: 32, 128>}, {pipeline_mode = #tpu.pipeline_mode<synchronous>, transform_indices = @transform_5, window_bounds = array<i64: 1, 128>}, {transform_indices = @transform_6, window_bounds = array<i64: 8, 32>}]} {
    %c0 = arith.constant 0 : index
    %c0_0 = arith.constant 0 : index
    %0 = vector.load %arg1[%c0, %c0_0] : memref<8x16xf32, #tpu.memory_space<vmem>>, vector<8x16xf32>
    %c0_1 = arith.constant 0 : index
    %c0_2 = arith.constant 0 : index
    %1 = vector.load %arg2[%c0_1, %c0_2] : memref<8x32xf32, #tpu.memory_space<vmem>>, vector<8x32xf32>
    %c0_3 = arith.constant 0 : index
    %c0_4 = arith.constant 0 : index
    %2 = vector.load %arg4[%c0_3, %c0_4] : memref<16x128xf32, #tpu.memory_space<vmem>>, vector<16x128xf32>
    %cst = arith.constant dense<0.000000e+00> : vector<8x128xf32>
    %3 = tpu.matmul %0, %2, %cst {dimension_numbers = #tpu.dot_dimension_numbers<[1], [0], [0], [1], [0, 0, 1, 1], [], []>} : vector<8x16xf32>, vector<16x128xf32>, vector<8x128xf32> -> vector<8x128xf32>
    %c0_5 = arith.constant 0 : index
    %c0_6 = arith.constant 0 : index
    %4 = vector.load %arg5[%c0_5, %c0_6] : memref<32x128xf32, #tpu.memory_space<vmem>>, vector<32x128xf32>
    %cst_7 = arith.constant dense<0.000000e+00> : vector<8x128xf32>
    %5 = tpu.matmul %1, %4, %cst_7 {dimension_numbers = #tpu.dot_dimension_numbers<[1], [0], [0], [1], [0, 0, 1, 1], [], []>} : vector<8x32xf32>, vector<32x128xf32>, vector<8x128xf32> -> vector<8x128xf32>
    %6 = arith.addf %3, %5 : vector<8x128xf32>
    %c0_8 = arith.constant 0 : index
    %c0_9 = arith.constant 0 : index
    %7 = vector.load %arg6[%c0_8, %c0_9] : memref<1x128xf32, #tpu.memory_space<vmem>>, vector<1x128xf32>
    %8 = vector.broadcast %7 : vector<1x128xf32> to vector<8x128xf32>
    %9 = arith.addf %6, %8 : vector<8x128xf32>
    %10 = vector.extract_strided_slice %9 {offsets = [0, 0], sizes = [8, 32], strides = [1, 1]} : vector<8x128xf32> to vector<8x32xf32>
    %11 = arith.negf %10 : vector<8x32xf32>
    %12 = math.exp %11 : vector<8x32xf32>
    %cst_10 = arith.constant 1.000000e+00 : f32
    %13 = vector.broadcast %cst_10 : f32 to vector<8x32xf32>
    %14 = arith.addf %13, %12 : vector<8x32xf32>
    %15 = arith.divf %13, %14 : vector<8x32xf32>
    %16 = vector.extract_strided_slice %9 {offsets = [0, 32], sizes = [8, 32], strides = [1, 1]} : vector<8x128xf32> to vector<8x32xf32>
    %17 = arith.negf %16 : vector<8x32xf32>
    %18 = math.exp %17 : vector<8x32xf32>
    %cst_11 = arith.constant 1.000000e+00 : f32
    %19 = vector.broadcast %cst_11 : f32 to vector<8x32xf32>
    %20 = arith.addf %19, %18 : vector<8x32xf32>
    %21 = arith.divf %19, %20 : vector<8x32xf32>
    %22 = vector.extract_strided_slice %9 {offsets = [0, 64], sizes = [8, 32], strides = [1, 1]} : vector<8x128xf32> to vector<8x32xf32>
    %23 = vector.extract_strided_slice %9 {offsets = [0, 96], sizes = [8, 32], strides = [1, 1]} : vector<8x128xf32> to vector<8x32xf32>
    %24 = arith.mulf %15, %23 : vector<8x32xf32>
    %25 = arith.addf %22, %24 : vector<8x32xf32>
    %26 = math.tanh %25 : vector<8x32xf32>
    %c0_12 = arith.constant 0 : index
    %c0_13 = arith.constant 0 : index
    %27 = vector.load %arg3[%c0_12, %c0_13] : memref<8x1xf32, #tpu.memory_space<vmem>>, vector<8x1xf32>
    %28 = vector.broadcast %27 : vector<8x1xf32> to vector<8x32xf32>
    %29 = arith.mulf %28, %21 : vector<8x32xf32>
    %cst_14 = arith.constant 1.000000e+00 : f32
    %30 = vector.broadcast %cst_14 : f32 to vector<8x32xf32>
    %31 = arith.subf %30, %29 : vector<8x32xf32>
    %32 = arith.mulf %31, %1 : vector<8x32xf32>
    %33 = arith.mulf %29, %26 : vector<8x32xf32>
    %34 = arith.addf %32, %33 : vector<8x32xf32>
    %c0_15 = arith.constant 0 : index
    %c0_16 = arith.constant 0 : index
    %35 = vector.load %arg7[%c0_15, %c0_16] : memref<8x32xf32, #tpu.memory_space<vmem>>, vector<8x32xf32>
    tpu.vector_store %arg7[%c0_15, %c0_16], %34 {strides = array<i32>} : memref<8x32xf32, #tpu.memory_space<vmem>>, vector<8x32xf32>,
    return
  }
  func.func @transform_0(%arg0: i32) -> (i32, i32) {
    %c0_i32 = arith.constant 0 : i32
    %c0_i32_0 = arith.constant 0 : i32
    return %arg0, %c0_i32 : i32, i32
  }
  func.func @transform_1(%arg0: i32) -> (i32, i32) {
    %c0_i32 = arith.constant 0 : i32
    %c0_i32_0 = arith.constant 0 : i32
    return %arg0, %c0_i32 : i32, i32
  }
  func.func @transform_2(%arg0: i32) -> (i32, i32) {
    %c0_i32 = arith.constant 0 : i32
    %c0_i32_0 = arith.constant 0 : i32
    return %arg0, %c0_i32 : i32, i32
  }
  func.func @transform_3(%arg0: i32) -> (i32, i32) {
    %c0_i32 = arith.constant 0 : i32
    %c0_i32_0 = arith.constant 0 : i32
    %c0_i32_1 = arith.constant 0 : i32
    return %c0_i32, %c0_i32_0 : i32, i32
  }
  func.func @transform_4(%arg0: i32) -> (i32, i32) {
    %c0_i32 = arith.constant 0 : i32
    %c0_i32_0 = arith.constant 0 : i32
    %c0_i32_1 = arith.constant 0 : i32
    return %c0_i32, %c0_i32_0 : i32, i32
  }
  func.func @transform_5(%arg0: i32) -> (i32, i32) {
    %c0_i32 = arith.constant 0 : i32
    %c0_i32_0 = arith.constant 0 : i32
    %c0_i32_1 = arith.constant 0 : i32
    return %c0_i32, %c0_i32_0 : i32, i32
  }
  func.func @transform_6(%arg0: i32) -> (i32, i32) {
    %c0_i32 = arith.constant 0 : i32
    %c0_i32_0 = arith.constant 0 : i32
    return %arg0, %c0_i32 : i32, i32
  }
}

</mosaic_0001>

<bundles_post_ra>
// kernel: tpu_custom_call.1
= control target key start
LH: loop header
LB: loop body
LE: loop exit
PB: predicated region body
PF: predicated region fallthrough
CT: control target
= control target key end

     0   :  { %11 = vsyncpa [#allocation3], 0  ;;  %s545_s0 = inlined_call_operand.hbm [shape: f32[8,16], index: 0, kind: input, shape index: {}]   ;;  %s546_s1 = inlined_call_operand.hbm [shape: f32[8,32], index: 1, kind: input, shape index: {}]   ;;  %s547_s2 = inlined_call_operand.vmem [shape: f32[8,1], index: 2, kind: input, shape index: {}]   ;;  %s548_s3 = inlined_call_operand.vmem [shape: f32[16,128], index: 3, kind: input, shape index: {}]   ;;  %s549_s4 = inlined_call_operand.hbm [shape: f32[32,128], index: 4, kind: input, shape index: {}]   ;;  %s550_s5 = inlined_call_operand.vmem [shape: f32[1,128], index: 5, kind: input, shape index: {}]   ;;  %s551_s6 = inlined_call_operand.hbm [shape: f32[8,32], index: 6, kind: output, shape index: {}]  }
   0x1   :  { %12 = vsyncpa [#allocation6], 0 }
   0x2   :  { %13 = vsyncpa [#allocation4], 0  ;;  %s435_s21 = smov [#allocation5]   ;;  %s436_s23 = smov [#allocation2]  }
   0x3   :  { %s30_s22 = sshll.u32 %s435_s21, 4  ;;  %s20_s24 = sshll.u32 %s436_s23, 4  ;;  %s31_s22 = int_to_ptr.vmem [resolvable:$true] %s30_s22  ;;  %s21_s24 = int_to_ptr.vmem [resolvable:$true] %s20_s24 }
   0x4   :  { %s341_s27 = scalar_lea.hbm %s546_s1, 128 }
   0x5   :  { %p342_p0 = scmp.ne.s32.totalorder %s546_s1, %s341_s27  ;;  %p345_p1 = scmp.lt.u32.totalorder %s341_s27, %s546_s1 }
   0x7   :  { %p347_p2 = pnand %p345_p1, %p342_p0 }
   0x9   :  { %350 = shalt.err (!%p347_p2)
}
   0xa   :  { %s351_s8 = scalar_lea.vmem %s31_s22, 128  ;;  %p356_p4 = scmp.lt.s32.totalorder %s31_s22, %s31_s22 }
   0xb   :  { %p352_p3 = scmp.ne.s32.totalorder %s31_s22, %s351_s8  ;;  %p357_p5 = scmp.lt.s32.totalorder %s351_s8, %s351_s8 }
   0xd   :  { %p358_p6 = por %p357_p5, %p356_p4 }
   0xf   :  { %p359_p7 = pnand %p358_p6, %p352_p3 }
  0x11   :  { %362 = shalt.err (!%p359_p7)
}
  0x12   :  { %33 = dma.hbm_to_vmem [thread:$0]  %s546_s1, 128, %s31_s22, [#allocation6]  }
  0x13   :  { %s363_s13 = scalar_lea.hbm %s545_s0, 128 }
  0x14   :  { %p364_p8 = scmp.ne.s32.totalorder %s545_s0, %s363_s13  ;;  %p367_p9 = scmp.lt.u32.totalorder %s363_s13, %s545_s0 }
  0x16   :  { %p369_p10 = pnand %p367_p9, %p364_p8 }
  0x18   :  { %372 = shalt.err (!%p369_p10)
}
  0x19   :  { %s373_s18 = scalar_lea.vmem %s21_s24, 128  ;;  %p378_p12 = scmp.lt.s32.totalorder %s21_s24, %s21_s24 }
  0x1a   :  { %p374_p11 = scmp.ne.s32.totalorder %s21_s24, %s373_s18  ;;  %p379_p13 = scmp.lt.s32.totalorder %s373_s18, %s373_s18 }
  0x1c   :  { %p380_p0 = por %p379_p13, %p378_p12 }
  0x1e   :  { %p381_p1 = pnand %p380_p0, %p374_p11 }
  0x20   :  { %384 = shalt.err (!%p381_p1)
}
  0x21   :  { %23 = dma.hbm_to_vmem [thread:$0]  %s545_s0, 128, %s21_s24, [#allocation3]  }
  0x22   :  { %s437_s20 = smov [#allocation7]   ;;  %s385_s25 = scalar_lea.hbm %s549_s4, 512 }
  0x23   :  { %s43_s21 = sshll.u32 %s437_s20, 4  ;;  %p386_p2 = scmp.ne.s32.totalorder %s549_s4, %s385_s25  ;;  %s44_s21 = int_to_ptr.vmem [resolvable:$true] %s43_s21 }
  0x24   :  { %p389_p3 = scmp.lt.u32.totalorder %s385_s25, %s549_s4 }
  0x26   :  { %p391_p4 = pnand %p389_p3, %p386_p2 }
  0x28   :  { %394 = shalt.err (!%p391_p4)
}
  0x29   :  { %s395_s30 = scalar_lea.vmem %s44_s21, 512  ;;  %p400_p6 = scmp.lt.s32.totalorder %s44_s21, %s44_s21 }
  0x2a   :  { %p396_p5 = scmp.ne.s32.totalorder %s44_s21, %s395_s30  ;;  %p401_p7 = scmp.lt.s32.totalorder %s395_s30, %s395_s30 }
  0x2c   :  { %p402_p8 = por %p401_p7, %p400_p6 }
  0x2e   :  { %p403_p9 = pnand %p402_p8, %p396_p5 }
  0x30   :  { %406 = shalt.err (!%p403_p9)
}
  0x31   :  { %s438_s0 = smov 128   ;;  %s439_s24 = smov 8  }
  0x32   :  { %49 = dma.hbm_to_vmem [thread:$0]  %s549_s4, 512, %s44_s21, [#allocation6], %s438_s0, %s438_s0, %s439_s24  }
  0x33   :  { %429 = dma.done.wait [#allocation3], 128  }
  0x34   :  { %430 = vsyncadd [#allocation3], 4294967168 }
  0x35   :  { %431 = dma.done.wait [#allocation6], 640  }
  0x36   :  { %432 = vsyncadd [#allocation6], 4294966656  ;;  %v440_v0 = vmov 0.0|0.0   ;;  %vm441_vm0 = vmmov 0   ;;  %v442_v1 = vmov 0.0   ;;  %v443_v2 = vmov 0  }
  0x37   :  { %311 = vmatprep.subr.bf16.mxu0 %v440_v0  ;;  %317 = vmatprep.subr.bf16.mxu1 %v440_v0  ;;  %v65_v3 = vld [vmem:[#allocation7] sm:$0xff]  ;;  %v66_v4 = vld [vmem:[#allocation7 + $0x8] sm:$0xff]  ;;  %v63_v5 = vld [vmem:[%s548_s3] sm:$0xff]  ;;  %vm143_vm1 = vcmask 130048   ;;  %vm69_vm2 = vcmask 261120   ;;  %s444_s14 = smov 32  }
  0x38   :  { %308 = vmatprep.mubr.msk.f32.mxu1 %vm441_vm0, %v442_v1  ;;  %301 = vmatprep.mubr.msk.f32.mxu0 %vm441_vm0, %v442_v1  ;;  %v312_v6 = vpack.c.bf16 %v66_v4, %v65_v3  ;;  %v64_v7 = vld [vmem:[%s548_s3 + $0x8] sm:$0xff]  ;;  %v67_v8 = vld [vmem:[#allocation7 + $0x10] sm:$0xff]  ;;  %s445_s15 = smov 64   ;;  %s446_s16 = smov 96  }
  0x39   :  { %333 = vset.pattern.permute.xlu1 %v443_v2  ;;  %334 = vset.pattern.permute.xlu0 %v443_v2  ;;  %v68_v9 = vld [vmem:[#allocation7 + $0x18] sm:$0xff]  ;;  %v318_v10 = vpack.c.bf16 %v64_v7, %v63_v5  ;;  %v242_v11 = vld [vmem:[%s547_s2] sm:$0xff] }
  0x3a   :  { %313 = vmatpush3.bf16.msra.mxu0 %v312_v6  ;;  %v315_v12 = vpack.c.bf16 %v68_v9, %v67_v8  ;;  %245 = vperm.xlu1 %333, %v242_v11   ;;  %v61_v13 = vld [vmem:[#allocation2] sm:$0xff]  ;;  %v62_v14 = vld [vmem:[#allocation5] sm:$0xff] }
  0x3b   :  { %314 = vmatprep.subr.bf16.mxu0 %v440_v0  ;;  %319 = vmatpush3.bf16.msra.mxu1 %v318_v10  ;;  %v283_v18 = vld [vmem:[%s550_s5] ss:$0 sm:$0xff]  ;;  %s447_s5 = smov [#allocation8]  }
  0x3c   :  { %s271_s17 = sshll.u32 %s447_s5, 4  ;;  %s272_s17 = int_to_ptr.vmem [resolvable:$true] %s271_s17 }
  0x3d   :  { %s407_s18 = scalar_lea.vmem %s272_s17, 128  ;;  %p412_p11 = scmp.lt.s32.totalorder %s272_s17, %s272_s17 }
  0x3e   :  { %316 = vmatpush3.bf16.msra.mxu0 %v315_v12  ;;  %309 = vmatmul.mubr.msk.f32.vlgmr.msra.gmra.mrb[0].mxu1 %vm143_vm1, %v61_v13  ;;  %p408_p10 = scmp.ne.s32.totalorder %s272_s17, %s407_s18  ;;  %p413_p12 = scmp.lt.s32.totalorder %s407_s18, %s407_s18 }
  0x3f   :  { %250 = vrot.lane.b32.xlu1 %v62_v14, %s444_s14 }
  0x40   :  { %p414_p13 = por %p413_p12, %p412_p11 }
  0x41   :  { %302 = vmatmul.mubr.msk.f32.vlgmr.msra.gmra.mrb[0].mxu0 %vm69_vm2, %v62_v14 }
  0x42   :  { %p415_p0 = pnand %p414_p13, %p408_p10 }
  0xb9   :  { %v246_v31 = vpop.permute.xlu1 %245 }
  0xbd   :  { %v251_v34 = vpop.permute.xlu1 %250 }
 0x111   :  { %v213_v15 = vpop.f32.mrb[0].mxu1 }
 0x112   :  { %v310_v16 = vpop.f32.mrb[1].mxu1 }
 0x114   :  { %v139_v17 = vpop.f32.mrb[0].mxu0 }
 0x115   :  { %v214_v19 = vadd.f32 %v213_v15, %v139_v17  ;;  %v303_v20 = vpop.f32.mrb[1].mxu0 }
 0x117   :  { %v224_v21 = vadd.f32 %v283_v18, %v214_v19 }
 0x119   :  { %232 = vrot.lane.b32.xlu0 %v224_v21, %s444_s14  ;;  %v284_v22 = vmul.f32 -1.442695, %v224_v21 }
 0x11b   :  { %335 = vpow2.f32 %v284_v22 }
 0x125   :  { %v336_v23 = vpop.eup %335 }
 0x126   :  { %v228_v24 = vadd.f32 1.0, %v336_v23 }
 0x128   :  { %337 = vrcp.f32 %v228_v24 }
 0x132   :  { %v338_v25 = vpop.eup %337 }
 0x133   :  { %v248_v32 = vmul.f32 %v338_v25, %v246_v31 }
 0x135   :  { %v249_v33 = vsub.f32 1.0, %v248_v32 }
 0x137   :  { %v253_v36 = vmul.f32 %v251_v34, %v249_v33 }
 0x18b   :  { %v233_v26 = vpop.permute.xlu0 %232 }
 0x18c   :  { %v235_v27 = vmul.f32 %v338_v25, %v233_v26 }
 0x18e   :  { %237 = vrot.lane.b32.xlu0 %v235_v27, %s445_s15 }
 0x200   :  { %v238_v28 = vpop.permute.xlu0 %237 }
 0x201   :  { %v240_v29 = vadd.f32 %v238_v28, %v224_v21 }
 0x203   :  { %339 = vtanh.f32 %v240_v29 }
 0x20d   :  { %v340_v30 = vpop.eup %339 }
 0x20e   :  { %255 = vrot.lane.b32.xlu0 %v340_v30, %s446_s16 }
 0x280   :  { %v256_v35 = vpop.permute.xlu0 %255 }
 0x281   :  { %v258_v37 = vmul.f32 %v256_v35, %v248_v32 }
 0x283   :  { %v259_v38 = vadd.f32 %v258_v37, %v253_v36 }
 0x285   :  { %261 = vrot.lane.b32.xlu1 %v259_v38, %s446_s16 }
 0x2f7   :  { %v262_v39 = vpop.permute.xlu1 %261 }
 0x2f8   :  { %264 = vst.msk [vmem:[#allocation8] sm:$0xff] %vm69_vm2, %v262_v39 }
 0x2f9   :  { %418 = shalt.err (!%p415_p0)
}
 0x2fa   :  { %s419_s20 = scalar_lea.hbm %s551_s6, 128 }
 0x2fb   :  { %p420_p1 = scmp.ne.s32.totalorder %s551_s6, %s419_s20  ;;  %p423_p2 = scmp.lt.u32.totalorder %s419_s20, %s551_s6 }
 0x2fd   :  { %p425_p3 = pnand %p423_p2, %p420_p1 }
 0x2ff   :  { %428 = shalt.err (!%p425_p3)
}
 0x300   :  { %274 = dma.vmem_to_hbm [thread:$0]  %s272_s17, 128, %s551_s6, [#allocation4]  }
 0x301   :  { %433 = dma.done.wait [#allocation4], 128  }
 0x302   :  { %434 = vsyncadd [#allocation4], 4294967168 }
 0x303   :  { %278 = vsyncpa [#allocation3], 1 }
 0x304   :  { %279 = vsyncpa [#allocation6], 1 }
 0x305   :  { %280 = vsyncpa [#allocation4], 1 }

</bundles_post_ra>
